<compile_context>
chip_gen: v6e
topology: v6e:2x2x1
jax: 0.10.0
libtpu: 0.0.40
codegen_flags: <defaults>
</compile_context>

<pallas_src>
import functools

import jax
import jax.numpy as jnp
from jax.experimental import pallas as pl
from jax.experimental.pallas import tpu as pltpu


def _condense_lgc_kernel(x_ref, a_ref, shift_ref, w_ref, o_ref, *, activation):
    # x_ref:     (1, Cin_x, TM)   spatial tile of one batch element (channels x lanes)
    # a_ref:     (Cin_sel, Cin_x) gather + BN-scale folded matrix
    # shift_ref: (Cin_sel, 1)     BN shift (f32)
    # w_ref:     (Cout, Cin_sel)  grouped 1x1 weight, dense-expanded + shuffle-permuted
    # o_ref:     (1, Cout, TM)
    x = x_ref[0]                                                   # (Cin_x, TM)

    # index_select + BatchNorm (eval-mode affine), f32 accumulation.
    y = jnp.dot(a_ref[...], x, preferred_element_type=jnp.float32)
    y = y + shift_ref[...]                                         # (Cin_sel, TM), f32

    if activation == "ReLU":
        y = jnp.maximum(y, 0.0)
    elif activation == "HS":
        y = y * jnp.clip(y + 3.0, 0.0, 6.0) * (1.0 / 6.0)
    else:
        raise NotImplementedError(activation)

    # Grouped 1x1 conv + channel shuffle (folded into w) as one MXU matmul.
    y = y.astype(x.dtype)
    out = jnp.dot(w_ref[...], y, preferred_element_type=jnp.float32)
    o_ref[0] = out.astype(o_ref.dtype)


def condense_lgc_forward(x_nchw, index, conv_weight, gamma, beta,
                         running_mean, running_var, *, groups=1,
                         activation="ReLU", eps=1e-5, tm=1024):
    """CondenseLGC forward.

    x_nchw:      (N, Cin_x, H, W)
    index:       (Cin_sel,) int32 channel-gather indices into Cin_x
    conv_weight: (Cout, Cin_sel // groups, 1, 1)
    gamma/beta/running_mean/running_var: (Cin_sel,)
    """
    n, cin_x, h, w = x_nchw.shape
    cout = conv_weight.shape[0]
    cin_sel = index.shape[0]
    cpg_in = cin_sel // groups
    cpg_out = cout // groups
    assert conv_weight.shape[1] == cpg_in
    hw = h * w
    dtype = x_nchw.dtype

    # ---- fold index_select + BN into (A, shift) ----
    scale = gamma / jnp.sqrt(running_var + eps)                     # (Cin_sel,)
    shift = (beta - running_mean * scale).astype(jnp.float32)       # (Cin_sel,)
    onehot = jax.nn.one_hot(index, cin_x, dtype=jnp.float32)        # (Cin_sel, Cin_x)
    a_mat = (scale[:, None] * onehot).astype(dtype)

    # ---- dense-expand grouped weight, fold ShuffleLayer as a row permutation ----
    w2 = conv_weight[:, :, 0, 0].astype(jnp.float32)                # (Cout, cpg_in)
    eye_g = jnp.eye(groups, dtype=jnp.float32)
    w_dense = (eye_g[:, None, :, None] *
               w2.reshape(groups, cpg_out, 1, cpg_in)).reshape(cout, cin_sel)
    perm = jnp.arange(cout).reshape(groups, cpg_out).T.reshape(-1)  # shuffle permutation
    w_shuf = w_dense[perm].astype(dtype)                            # (Cout, Cin_sel)

    shift2d = shift.reshape(cin_sel, 1)

    # ---- channels-first layout: free reshape, no transposes ----
    x3 = x_nchw.reshape(n, cin_x, hw)

    # ---- spatial tiling (lane axis): big tiles, cdiv grid, ragged last tile OK ----
    if hw <= tm:
        tm_eff = hw
    else:
        tm_eff = max(128, (tm // 128) * 128)
    grid_m = pl.cdiv(hw, tm_eff)

    kernel = functools.partial(_condense_lgc_kernel, activation=activation)

    itemsize = jnp.dtype(dtype).itemsize
    cost = pl.CostEstimate(
        flops=2 * n * hw * (cin_sel * cin_x + cout * cin_sel),
        transcendentals=0,
        bytes_accessed=int((n * cin_x * hw + n * cout * hw) * itemsize
                           + (cin_sel * cin_x + cout * cin_sel) * itemsize
                           + cin_sel * 4),
    )

    out3 = pl.pallas_call(
        kernel,
        out_shape=jax.ShapeDtypeStruct((n, cout, hw), dtype),
        grid_spec=pltpu.PrefetchScalarGridSpec(
            num_scalar_prefetch=0,
            grid=(n, grid_m),
            in_specs=[
                pl.BlockSpec((1, cin_x, tm_eff), lambda b, j: (b, 0, j)),
                pl.BlockSpec((cin_sel, cin_x), lambda b, j: (0, 0)),
                pl.BlockSpec((cin_sel, 1), lambda b, j: (0, 0)),
                pl.BlockSpec((cout, cin_sel), lambda b, j: (0, 0)),
            ],
            out_specs=pl.BlockSpec((1, cout, tm_eff), lambda b, j: (b, 0, j)),
        ),
        compiler_params=pltpu.CompilerParams(
            dimension_semantics=("parallel", "parallel"),
            vmem_limit_bytes=48 * 1024 * 1024,
        ),
        cost_estimate=cost,
    )(x3, a_mat, shift2d, w_shuf)

    return out3.reshape(n, cout, h, w)          # free reshape back to NCHW


def _reference(x, index, conv_weight, gamma, beta, running_mean, running_var,
               *, groups, activation, eps=1e-5):
    xs = x[:, index, :, :]
    scale = gamma / jnp.sqrt(running_var + eps)
    shift = beta - running_mean * scale
    y = xs * scale[None, :, None, None] + shift[None, :, None, None]
    if activation == "ReLU":
        y = jnp.maximum(y, 0.0)
    else:
        y = y * jnp.clip(y + 3.0, 0.0, 6.0) / 6.0
    out = jax.lax.conv_general_dilated(
        y, conv_weight, window_strides=(1, 1), padding="VALID",
        dimension_numbers=("NCHW", "OIHW", "NCHW"),
        feature_group_count=groups)
    n, co, hh, ww = out.shape
    cpg = co // groups
    out = out.reshape(n, groups, cpg, hh, ww).transpose(0, 2, 1, 3, 4).reshape(n, co, hh, ww)
    return out


if __name__ == "__main__":
    key = jax.random.PRNGKey(0)
    k_x, k_i, k_w, k_g, k_b, k_m, k_v = jax.random.split(key, 7)

    # CondenseLGC(in_channels=8, out_channels=16, kernel_size=1, groups=4)
    N, Cin_x, Cin_sel, Cout, G, H, W = 2, 8, 8, 16, 4, 16, 16

    x = jax.random.normal(k_x, (N, Cin_x, H, W), dtype=jnp.float32)
    # NOTE: the module's `index` buffer is fill_(0) at init; a non-trivial index
    # exercises the general gather semantics of torch.index_select.
    index = jax.random.randint(k_i, (Cin_sel,), 0, Cin_x, dtype=jnp.int32)
    conv_weight = jax.random.normal(k_w, (Cout, Cin_sel // G, 1, 1), dtype=jnp.float32) * 0.1
    gamma = jax.random.normal(k_g, (Cin_sel,), dtype=jnp.float32) * 0.5 + 1.0
    beta = jax.random.normal(k_b, (Cin_sel,), dtype=jnp.float32) * 0.1
    running_mean = jax.random.normal(k_m, (Cin_sel,), dtype=jnp.float32) * 0.1
    running_var = jax.random.uniform(k_v, (Cin_sel,), dtype=jnp.float32,
                                     minval=0.5, maxval=1.5)

    ok = True
    for act in ("ReLU", "HS"):
        out = condense_lgc_forward(x, index, conv_weight, gamma, beta,
                                   running_mean, running_var,
                                   groups=G, activation=act)
        out = jax.block_until_ready(out)
        ref = _reference(x, index, conv_weight, gamma, beta,
                         running_mean, running_var, groups=G, activation=act)
        ok = ok and (out.shape == (N, Cout, H, W))
        ok = ok and bool(jnp.allclose(out, ref, atol=1e-4, rtol=1e-4))

    assert ok
    print("KERNEL_OK")
</pallas_src>

<mosaic_0001>
module attributes {stable_mosaic.version = 11 : i64} {
  func.func @_condense_lgc_kernel(%arg0: i32, %arg1: i32, %arg2: memref<1x8x256xf32, #tpu.memory_space<vmem>>, %arg3: memref<8x8xf32, #tpu.memory_space<vmem>>, %arg4: memref<8x1xf32, #tpu.memory_space<vmem>>, %arg5: memref<16x8xf32, #tpu.memory_space<vmem>>, %arg6: memref<1x16x256xf32, #tpu.memory_space<vmem>>) attributes {dimension_semantics = [#tpu.dimension_semantics<parallel>, #tpu.dimension_semantics<parallel>], iteration_bounds = array<i64: 2, 1>, scalar_prefetch = 0 : i64, scratch_operands = 0 : i64, tpu.core_type = #tpu.core_type<tc>, window_params = [{transform_indices = @transform_0, window_bounds = array<i64: 1, 8, 256>}, {pipeline_mode = #tpu.pipeline_mode<synchronous>, transform_indices = @transform_1, window_bounds = array<i64: 8, 8>}, {pipeline_mode = #tpu.pipeline_mode<synchronous>, transform_indices = @transform_2, window_bounds = array<i64: 8, 1>}, {pipeline_mode = #tpu.pipeline_mode<synchronous>, transform_indices = @transform_3, window_bounds = array<i64: 16, 8>}, {transform_indices = @transform_4, window_bounds = array<i64: 1, 16, 256>}]} {
    %c0 = arith.constant 0 : index
    %c0_0 = arith.constant 0 : index
    %c0_1 = arith.constant 0 : index
    %0 = vector.load %arg2[%c0, %c0_0, %c0_1] : memref<1x8x256xf32, #tpu.memory_space<vmem>>, vector<1x8x256xf32>
    %1 = vector.shape_cast %0 : vector<1x8x256xf32> to vector<8x256xf32>
    %c0_2 = arith.constant 0 : index
    %c0_3 = arith.constant 0 : index
    %2 = vector.load %arg3[%c0_2, %c0_3] : memref<8x8xf32, #tpu.memory_space<vmem>>, vector<8x8xf32>
    %cst = arith.constant dense<0.000000e+00> : vector<8x256xf32>
    %3 = tpu.matmul %2, %1, %cst {dimension_numbers = #tpu.dot_dimension_numbers<[1], [0], [0], [1], [0, 0, 1, 1], [], []>} : vector<8x8xf32>, vector<8x256xf32>, vector<8x256xf32> -> vector<8x256xf32>
    %c0_4 = arith.constant 0 : index
    %c0_5 = arith.constant 0 : index
    %4 = vector.load %arg4[%c0_4, %c0_5] : memref<8x1xf32, #tpu.memory_space<vmem>>, vector<8x1xf32>
    %5 = vector.broadcast %4 : vector<8x1xf32> to vector<8x256xf32>
    %6 = arith.addf %3, %5 : vector<8x256xf32>
    %cst_6 = arith.constant 0.000000e+00 : f32
    %7 = vector.broadcast %cst_6 : f32 to vector<8x256xf32>
    %8 = arith.maximumf %6, %7 : vector<8x256xf32>
    %c0_7 = arith.constant 0 : index
    %c0_8 = arith.constant 0 : index
    %9 = vector.load %arg5[%c0_7, %c0_8] : memref<16x8xf32, #tpu.memory_space<vmem>>, vector<16x8xf32>
    %cst_9 = arith.constant dense<0.000000e+00> : vector<16x256xf32>
    %10 = tpu.matmul %9, %8, %cst_9 {dimension_numbers = #tpu.dot_dimension_numbers<[1], [0], [0], [1], [0, 0, 1, 1], [], []>} : vector<16x8xf32>, vector<8x256xf32>, vector<16x256xf32> -> vector<16x256xf32>
    %c0_10 = arith.constant 0 : index
    %c0_11 = arith.constant 0 : index
    %c0_12 = arith.constant 0 : index
    %11 = vector.load %arg6[%c0_10, %c0_11, %c0_12] : memref<1x16x256xf32, #tpu.memory_space<vmem>>, vector<1x16x256xf32>
    %12 = vector.shape_cast %11 : vector<1x16x256xf32> to vector<16x256xf32>
    %13 = vector.shape_cast %10 : vector<16x256xf32> to vector<1x16x256xf32>
    tpu.vector_store %arg6[%c0_10, %c0_11, %c0_12], %13 {strides = array<i32>} : memref<1x16x256xf32, #tpu.memory_space<vmem>>, vector<1x16x256xf32>,
    return
  }
  func.func @transform_0(%arg0: i32, %arg1: i32) -> (i32, i32, i32) {
    %c0_i32 = arith.constant 0 : i32
    %c0_i32_0 = arith.constant 0 : i32
    return %arg0, %c0_i32, %arg1 : i32, i32, i32
  }
  func.func @transform_1(%arg0: i32, %arg1: i32) -> (i32, i32) {
    %c0_i32 = arith.constant 0 : i32
    %c0_i32_0 = arith.constant 0 : i32
    %c0_i32_1 = arith.constant 0 : i32
    return %c0_i32, %c0_i32_0 : i32, i32
  }
  func.func @transform_2(%arg0: i32, %arg1: i32) -> (i32, i32) {
    %c0_i32 = arith.constant 0 : i32
    %c0_i32_0 = arith.constant 0 : i32
    %c0_i32_1 = arith.constant 0 : i32
    return %c0_i32, %c0_i32_0 : i32, i32
  }
  func.func @transform_3(%arg0: i32, %arg1: i32) -> (i32, i32) {
    %c0_i32 = arith.constant 0 : i32
    %c0_i32_0 = arith.constant 0 : i32
    %c0_i32_1 = arith.constant 0 : i32
    return %c0_i32, %c0_i32_0 : i32, i32
  }
  func.func @transform_4(%arg0: i32, %arg1: i32) -> (i32, i32, i32) {
    %c0_i32 = arith.constant 0 : i32
    %c0_i32_0 = arith.constant 0 : i32
    return %arg0, %c0_i32, %arg1 : i32, i32, i32
  }
}

</mosaic_0001>

<bundles_post_ra>
// kernel: tpu_custom_call.1
= control target key start
LH: loop header
LB: loop body
LE: loop exit
PB: predicated region body
PF: predicated region fallthrough
CT: control target
= control target key end

     0   :  { %9 = vsyncpa [#allocation3], 0  ;;  %s899_s0 = inlined_call_operand.vmem [shape: f32[2,8,256], index: 0, kind: input, shape index: {}]   ;;  %s900_s1 = inlined_call_operand.hbm [shape: f32[8,8], index: 1, kind: input, shape index: {}]   ;;  %s901_s2 = inlined_call_operand.vmem [shape: f32[8,1], index: 2, kind: input, shape index: {}]   ;;  %s902_s3 = inlined_call_operand.vmem [shape: f32[16,8], index: 3, kind: input, shape index: {}]   ;;  %s903_s4 = inlined_call_operand.hbm [shape: f32[2,16,256], index: 4, kind: output, shape index: {}]  }
   0x1   :  { %10 = vsyncpa [#allocation4], 0 }
   0x2   :  { %12 = vsyncpa [#allocation4 + $0x1], 0  ;;  %s752_s15 = smov 0   ;;  %s754_s16 = smov 0  }
   0x3   :  { %s756_s17 = smov 0   ;;  %s758_s18 = smov 0  }
   0x4   :  { %s760_s19 = smov 0   ;;  %s762_s20 = smov 0  }
   0x5 LB: > { %s522_s21 = sadd.s32 4294967295, %s719_s20   ;;  %s523_s22 = sadd.s32 4294967294, %s719_s20   ;;  %s719_s20 = sphi %s762_s20, %s18_s20   ;;  %s715_s19 = sphi %s760_s19, %s912_s19   ;;  %s711_s18 = sphi %s758_s18, %s911_s18   ;;  %s707_s17 = sphi %s756_s17, %s910_s17   ;;  %s703_s16 = sphi %s754_s16, %s909_s16   ;;  %s699_s15 = sphi %s752_s15, %s908_s15  }
   0x6   : > { %s30_s23 = sadd.s32 1, %s715_s19  ;;  %s130_s24 = sadd.s32 1, %s707_s17 }
   0x7   : > { %p32_p0 = scmp.ge.s32.totalorder %s30_s23, 2  ;;  %p140_p1 = scmp.ne.s32.totalorder %s707_s17, %s703_s16 }
   0x8   : > { %p141_p2 = scmp.eq.s32.totalorder %s522_s21, 1  ;;  %p146_p3 = scmp.ne.s32.totalorder %s703_s16, %s699_s15 }
   0x9   : > { %s914_s23 = smov (%p32_p0, %s30_s23), 0  ;;  %p147_p5 = scmp.eq.s32.totalorder %s523_s22, 1 }
   0xa   : > { %p792_p4 = por %p141_p2, %p140_p1  ;;  %s125_s26 = ssub.s32 %s715_s19, %s914_s23 }
   0xb   : > { %p524_p6 = scmp.ge.s32.totalorder %s719_s20, 1  ;;  %p128_p7 = scmp.eq.s32.totalorder %s125_s26, 0 }
   0xc   : > { %p799_p8 = por %p147_p5, %p146_p3  ;;  %p154_p9 = scmp.lt.s32.totalorder %s719_s20, 3 }
   0xd   : > { %s805_s28 = scalar_select %p128_p7, %s707_s17, %s130_s24  }
   0xe   : > { %p807_p10 = pnand %p524_p6, %p154_p9  ;;  %p811_p11 = scmp.eq.s32.totalorder %s522_s21, 0 }
   0xf   : > { %s721_s5 = smov [#allocation2]  }
  0x10   : > { %p548_p12 = pneg %p807_p10  ;;  %s167_s6 = sshll.u32 %s721_s5, 4  ;;  %s168_s6 = int_to_ptr.vmem [resolvable:$true] %s167_s6 }
  0x11   : > { %s624_s7 = scalar_lea.vmem %s168_s6, 128  ;;  %p632_p5 = scmp.lt.s32.totalorder %s168_s6, %s168_s6 }
  0x12   : > { %p549_p13 = pnand %p811_p11, %p548_p12  ;;  %p625_p1 = scmp.ne.s32.totalorder %s168_s6, %s624_s7 }
  0x13   : > { %p633_p6 = scmp.lt.s32.totalorder %s624_s7, %s624_s7 }
  0x14   : > { %p615_p0 = pneg %p549_p13 }
  0x15   : > { %p634_p7 = por %p633_p6, %p632_p5 }
  0x16   : > { %p627_p2 = pnand %p625_p1, %p615_p0 }
  0x18   : > { %p628_p3 = pneg %p627_p2 }
  0x1a   : > { %p635_p9 = pnand %p634_p7, %p628_p3 }
  0x1c   : > { %638 = shalt.err (!%p635_p9)
}
  0x1d   : > { %551 = dma.hbm_to_vmem [thread:$0]  (!%p549_p13), %s900_s1, 128, %s168_s6, [#allocation3]  }
  0x1e   : > { %199 = sbr.rel (%p807_p10) target bundleno = 459 (0x1cb), region = 36 }
  0x23   : > { %690 = dma.done.wait (%p811_p11), [#allocation3], 128  }
  0x24   : > { %692 = vsyncadd (%p811_p11), [#allocation3], 4294967168  ;;  %p230_p12 = scmp.lt.s32.totalorder %s711_s18, 1  ;;  %v722_v0 = vmov 0.0   ;;  %v723_v1 = vmov 0   ;;  %v242_v4 = vld [vmem:[#allocation2] sm:$0xff] }
  0x25   : > { %317 = vmatprep.mubr.f32.mxu0 %v722_v0  ;;  %612 = vset.pattern.permute.xlu0 %v723_v1  ;;  %vm249_vm0 = vcmask 64512   ;;  %v243_v5 = vld [vmem:[%s901_s2] sm:$0xff]  ;;  %v327_v14 = vld [vmem:[%s902_s3 + $0x8] sm:$0xff]  ;;  %s226_s5 = sand.u32 1, %s703_s16   ;;  %s541_s9 = sshll.u32 %s711_s18, 9 }
  0x26   : > { %s231_s10 = scalar_select %p230_p12, %s711_s18, 1  ;;  %398 = vmatprep.mubr.f32.mxu1 %v722_v0  ;;  %246 = vperm.xlu0 %612, %v243_v5   ;;  %v326_v13 = vld [vmem:[%s902_s3] sm:$0xff] }
  0x27   : > { %s529_s6 = sshll.u32 %s226_s5, 5  ;;  %s852_s12 = scalar_lea.hbm %s903_s4, %s541_s9 }
  0x28   : > { %s540_s11 = sshll.u32 %s231_s10, 4  ;;  %s228_s7 = scalar_lea.vmem [#allocation5], %s529_s6 }
  0x29   : > { %s237_s14 = scalar_lea.vmem %s899_s0, %s540_s11  ;;  %s431_s8 = sshll.u32 %s228_s7, 4  ;;  %s847_s8 = int_to_ptr.vmem [resolvable:$true] %s431_s8 }
  0x2a   : > { %v241_v2 = vld [vmem:[%s237_s14 + $0x8] sm:$0xff]  ;;  %v240_v3 = vld [vmem:[%s237_s14] sm:$0xff]  ;;  %s854_s13 = scalar_lea.sflag [#allocation4], %s226_s5  ;;  %s639_s14 = scalar_lea.vmem %s847_s8, 512 }
  0x2b   : > { %283 = vmatprep.subr.mxu0 %v241_v2  ;;  %p640_p10 = scmp.ne.s32.totalorder %s847_s8, %s639_s14  ;;  %s724_s18 = smov [#allocation5]  }
  0x2c   : > { %284 = vmatpush1.msra.mxu0 %v240_v3  ;;  %s643_s21 = sshll.u32 %s724_s18, 4  ;;  %s644_s21 = int_to_ptr.vmem [resolvable:$false] %s643_s21 }
  0x2d   : > { %532 = vmatmul.mubr.msk.f32.vlgmr.msra.gmra.mxu0 %vm249_vm0, %v242_v4  ;;  %p641_p11 = pnand %p640_p10, %p792_p4  ;;  %s645_s22 = scalar_lea.vmem %s644_s21, 1024 }
  0x2e   : > { %p646_p0 = scmp.lt.s32.totalorder %s847_s8, %s644_s21  ;;  %p647_p1 = scmp.lt.s32.totalorder %s645_s22, %s639_s14 }
  0x2f   : > { %p642_p13 = pneg %p641_p11 }
  0x30   : > { %p648_p2 = por %p647_p1, %p646_p0 }
  0x32   : > { %p649_p3 = pnand %p648_p2, %p642_p13 }
  0xa1   : > { %v247_v6 = vpop.permute.xlu0 %246 }
  0xed   : > { %v319_v7 = vpop.f32.mrf.mxu0 }
  0xee   : > { %v320_v8 = vadd.f32 %v319_v7, %v247_v6 }
  0xef   : > { %v321_v9 = vpop.f32.mrf.mxu0 }
  0xf0   : > { %v322_v10 = vadd.f32 %v321_v9, %v247_v6  ;;  %v324_v12 = vmax.f32 %v320_v8, 0.0 }
  0xf2   : > { %v325_v11 = vmax.f32 %v322_v10, 0.0 }
  0xf4   : > { %364 = vmatprep.subr.mxu1 %v325_v11 }
  0xf5   : > { %365 = vmatpush1.msra.mxu1 %v324_v12 }
  0xf6   : > { %533 = vmatmul.mubr.msk.f32.vlgmr.msra.gmra.mxu1 %vm249_vm0, %v326_v13 }
  0xf7   : > { %404 = vmatprep.mubr.f32.mxu1 %v722_v0 }
  0xfa   : > { %534 = vmatmul.mubr.msk.f32.gmra.mxu1 %vm249_vm0, %v327_v14 }
 0x1b6   : > { %v400_v15 = vpop.f32.mrf.mxu1 }
 0x1b7   : > { %411 = vst [vmem:[%s228_s7] sm:$0xff] %v400_v15 }
 0x1b8   : > { %v402_v16 = vpop.f32.mrf.mxu1 }
 0x1b9   : > { %412 = vst [vmem:[%s228_s7 + $0x8] sm:$0xff] %v402_v16 }
 0x1ba   : > { %v406_v17 = vpop.f32.mrf.mxu1 }
 0x1bb   : > { %413 = vst [vmem:[%s228_s7 + $0x10] sm:$0xff] %v406_v17 }
 0x1bc   : > { %v408_v18 = vpop.f32.mrf.mxu1 }
 0x1bd   : > { %414 = vst [vmem:[%s228_s7 + $0x18] sm:$0xff] %v408_v18 }
 0x1be   : > { %652 = shalt.err (!%p649_p3)
}
 0x1bf   : > { %s653_s24 = scalar_lea.hbm %s852_s12, 512  ;;  %s657_s30 = scalar_lea.hbm %s903_s4, 1024 }
 0x1c0   : > { %p654_p5 = scmp.ne.s32.totalorder %s852_s12, %s653_s24  ;;  %p658_p9 = scmp.lt.s32.totalorder %s852_s12, %s903_s4 }
 0x1c1   : > { %p659_p12 = scmp.lt.s32.totalorder %s657_s30, %s653_s24 }
 0x1c2   : > { %p655_p6 = pnand %p654_p5, %p792_p4 }
 0x1c3   : > { %p660_p10 = por %p659_p12, %p658_p9 }
 0x1c4   : > { %p656_p7 = pneg %p655_p6 }
 0x1c6   : > { %p661_p11 = pnand %p660_p10, %p656_p7 }
 0x1c8   : > { %664 = shalt.err (!%p661_p11)
}
 0x1c9   : > { %s725_s7 = smov 256   ;;  %s726_s9 = smov 16  }
 0x1ca   : > { %546 = dma.vmem_to_hbm [thread:$0]  (%p792_p4), %s847_s8, 512, %s852_s12, %s854_s13, %s725_s7, %s725_s7, %s726_s9  }
 0x1cb PF: > { %p558_p13 = scmp.ge.s32.totalorder %s719_s20, 2  ;;  %s446_s10 = sand.u32 1, %s699_s15  }
 0x1cc   : > { %s447_s11 = scalar_lea.sflag [#allocation4], %s446_s10 }
 0x1cd   : > { %p553_p0 = pnand %p558_p13, %p799_p8 }
 0x1cf   : > { %p554_p1 = pneg %p553_p0 }
 0x1d1   : > { %694 = dma.done.wait (%p554_p1), %s447_s11, 512  }
 0x1d2   : > { %696 = vsyncadd (%p554_p1), %s447_s11, 4294966784  ;;  %s18_s20 = sadd.s32 1, %s719_s20   ;;  %s908_s15 = smov %s703_s16 }
 0x1d3   : > { %p15_p2 = scmp.ge.s32.totalorder %s18_s20, 4   ;;  %s909_s16 = smov %s707_s17 }
 0x1d4   : > { %s910_s17 = smov %s805_s28  ;;  %s911_s18 = smov %s715_s19 }
 0x1d5   : > { %s912_s19 = smov %s914_s23  ;;  %17 = sbr.rel (!%p15_p2) target bundleno = 5 (0x5), region = 76 }
 0x1da   :  { %452 = vsyncpa [#allocation3], 1 }
 0x1db   :  { %454 = vsyncpa [#allocation3 + $0x1], 1 }
 0x1dc   :  { %455 = vsyncpa [#allocation4], 1 }
 0x1dd   :  { %457 = vsyncpa [#allocation4 + $0x1], 1 }

</bundles_post_ra>
